<compile_context>
chip_gen: v5e
topology: v5e:2x2
jax: 0.10.0
libtpu: 0.0.40
codegen_flags: <defaults>
</compile_context>

<pallas_src>
import functools

import jax
import jax.numpy as jnp
from jax.experimental import pallas as pl
from jax.experimental.pallas import tpu as pltpu


def _round_up(x, m):
    return (x + m - 1) // m * m


def _lm_head_kernel(x_ref, gamma_ref, beta_ref, w_ref, o_ref, y_scratch, *, eps):
    # x_ref:     (tm, D)   rows of hidden states
    # gamma_ref: (1, D)    LayerNorm weight
    # beta_ref:  (1, D)    LayerNorm bias
    # w_ref:     (tv, D)   lm_head weight tile in PyTorch (V, D) layout (bf16)
    # o_ref:     (tm, tv)  logits tile
    # y_scratch: (tm, D)   normalized activations, computed once per row tile

    # Hoisted LayerNorm: only on the first vocab tile of each row tile.
    @pl.when(pl.program_id(1) == 0)
    def _():
        x = x_ref[...].astype(jnp.float32)
        mean = jnp.mean(x, axis=-1, keepdims=True)
        xc = x - mean
        var = jnp.mean(xc * xc, axis=-1, keepdims=True)  # biased, as nn.LayerNorm
        inv = jax.lax.rsqrt(var + eps)
        y = xc * inv * gamma_ref[...].astype(jnp.float32) + beta_ref[...].astype(
            jnp.float32
        )
        y_scratch[...] = y.astype(y_scratch.dtype)

    # (tm, D) x (tv, D) contracted over D -> (tm, tv); bf16 operands, f32 acc.
    o_ref[...] = jax.lax.dot_general(
        y_scratch[...],
        w_ref[...],
        dimension_numbers=(((1,), (1,)), ((), ())),
        preferred_element_type=jnp.float32,
    ).astype(o_ref.dtype)


def gpt_lm_head(
    x,
    ln_weight,
    ln_bias,
    lm_head_weight,
    *,
    eps=1e-5,
    tm=256,
    tv=512,
    compute_dtype=jnp.bfloat16,
    out_dtype=None,
):
    """logits = LayerNorm(x) @ lm_head_weight.T

    x:              (B, S, D)
    ln_weight:      (D,)
    ln_bias:        (D,)
    lm_head_weight: (V, D)   -- PyTorch nn.Linear convention (not transposed)
    returns:        (B, S, V)
    """
    B, S, D = x.shape
    V = lm_head_weight.shape[0]
    M = B * S
    out_dtype = out_dtype or x.dtype

    # Shrink tiles for small problems; keep (8, 128) alignment; pad to multiples.
    tm_eff = min(tm, _round_up(M, 8))
    tv_eff = min(tv, _round_up(V, 128))
    m_pad = _round_up(M, tm_eff)
    v_pad = _round_up(V, tv_eff)

    x2 = x.reshape(M, D)
    if m_pad != M:
        x2 = jnp.pad(x2, ((0, m_pad - M), (0, 0)))

    # Cast the weight to bf16 once (halves HBM read traffic); keep (V, D) layout.
    w = lm_head_weight.astype(compute_dtype)
    if v_pad != V:
        w = jnp.pad(w, ((0, v_pad - V), (0, 0)))

    gamma = ln_weight.reshape(1, D)
    beta = ln_bias.reshape(1, D)

    kernel = functools.partial(_lm_head_kernel, eps=eps)

    out = pl.pallas_call(
        kernel,
        out_shape=jax.ShapeDtypeStruct((m_pad, v_pad), out_dtype),
        grid_spec=pltpu.PrefetchScalarGridSpec(
            num_scalar_prefetch=0,
            # Rows outer (parallel -> megacore shards M), vocab inner
            # (arbitrary -> sequential so the LN scratch is valid across j).
            grid=(m_pad // tm_eff, v_pad // tv_eff),
            in_specs=[
                pl.BlockSpec((tm_eff, D), lambda i, j: (i, 0)),
                pl.BlockSpec((1, D), lambda i, j: (0, 0)),
                pl.BlockSpec((1, D), lambda i, j: (0, 0)),
                pl.BlockSpec((tv_eff, D), lambda i, j: (j, 0)),
            ],
            out_specs=pl.BlockSpec((tm_eff, tv_eff), lambda i, j: (i, j)),
            scratch_shapes=[pltpu.VMEM((tm_eff, D), compute_dtype)],
        ),
        compiler_params=pltpu.CompilerParams(
            dimension_semantics=("parallel", "arbitrary"),
            vmem_limit_bytes=64 * 1024 * 1024,
        ),
    )(x2, gamma, beta, w)

    out = out[:M, :V]
    return out.reshape(B, S, V)


def _reference(x, ln_weight, ln_bias, lm_head_weight, eps=1e-5, matmul_dtype=jnp.float32):
    xf = x.astype(jnp.float32)
    mean = jnp.mean(xf, axis=-1, keepdims=True)
    var = jnp.mean((xf - mean) ** 2, axis=-1, keepdims=True)
    y = (xf - mean) * jax.lax.rsqrt(var + eps)
    y = y * ln_weight.astype(jnp.float32) + ln_bias.astype(jnp.float32)
    return jnp.dot(
        y.astype(matmul_dtype),
        lm_head_weight.T.astype(matmul_dtype),
        preferred_element_type=jnp.float32,
    )


if __name__ == "__main__":
    # Small GPT-like config: n_embd=32, vocab_size=256, batch=2, seq=8
    B, S, D, V = 2, 8, 32, 256
    eps = 1e-5

    key = jax.random.PRNGKey(0)
    kx, kw, kg, kb = jax.random.split(key, 4)

    x = jax.random.normal(kx, (B, S, D), dtype=jnp.float32)
    ln_weight = 1.0 + 0.02 * jax.random.normal(kg, (D,), dtype=jnp.float32)
    ln_bias = 0.02 * jax.random.normal(kb, (D,), dtype=jnp.float32)
    lm_head_weight = 0.02 * jax.random.normal(kw, (V, D), dtype=jnp.float32)

    out = gpt_lm_head(x, ln_weight, ln_bias, lm_head_weight, eps=eps)
    out = jax.block_until_ready(out)
    assert out.shape == (B, S, V), out.shape

    ref_bf16 = _reference(
        x, ln_weight, ln_bias, lm_head_weight, eps=eps, matmul_dtype=jnp.bfloat16
    )
    ref_f32 = _reference(
        x, ln_weight, ln_bias, lm_head_weight, eps=eps, matmul_dtype=jnp.float32
    )
    outf = out.astype(jnp.float32)
    assert jnp.allclose(outf, ref_bf16, atol=2e-3, rtol=2e-2), "mismatch vs bf16 ref"
    assert jnp.allclose(outf, ref_f32, atol=1e-2, rtol=5e-2), "mismatch vs f32 ref"

    # Non-tile-divisible shapes (exercise the padding path, e.g. vocab 50257-like).
    B2, S2, V2 = 2, 7, 200  # M=14 (not %8), V=200 (not %128)
    x_b = jax.random.normal(jax.random.PRNGKey(1), (B2, S2, D), dtype=jnp.float32)
    w_b = 0.02 * jax.random.normal(jax.random.PRNGKey(2), (V2, D), dtype=jnp.float32)
    out_b = jax.block_until_ready(
        gpt_lm_head(x_b, ln_weight, ln_bias, w_b, eps=eps)
    )
    ref_b = _reference(x_b, ln_weight, ln_bias, w_b, eps=eps, matmul_dtype=jnp.bfloat16)
    assert out_b.shape == (B2, S2, V2), out_b.shape
    assert jnp.allclose(out_b.astype(jnp.float32), ref_b, atol=2e-3, rtol=2e-2), (
        "mismatch vs bf16 ref (padded case)"
    )

    print("KERNEL_OK")
</pallas_src>

<mosaic_0001>
module attributes {stable_mosaic.version = 11 : i64} {
  func.func @_lm_head_kernel(%arg0: i32, %arg1: i32, %arg2: memref<16x32xf32, #tpu.memory_space<vmem>>, %arg3: memref<1x32xf32, #tpu.memory_space<vmem>>, %arg4: memref<1x32xf32, #tpu.memory_space<vmem>>, %arg5: memref<256x32xbf16, #tpu.memory_space<vmem>>, %arg6: memref<16x256xf32, #tpu.memory_space<vmem>>, %arg7: memref<16x32xbf16, #tpu.memory_space<vmem>>) attributes {dimension_semantics = [#tpu.dimension_semantics<parallel>, #tpu.dimension_semantics<arbitrary>], iteration_bounds = array<i64: 1, 1>, scalar_prefetch = 0 : i64, scratch_operands = 1 : i64, tpu.core_type = #tpu.core_type<tc>, window_params = [{transform_indices = @transform_0, window_bounds = array<i64: 16, 32>}, {pipeline_mode = #tpu.pipeline_mode<synchronous>, transform_indices = @transform_1, window_bounds = array<i64: 1, 32>}, {pipeline_mode = #tpu.pipeline_mode<synchronous>, transform_indices = @transform_2, window_bounds = array<i64: 1, 32>}, {transform_indices = @transform_3, window_bounds = array<i64: 256, 32>}, {transform_indices = @transform_4, window_bounds = array<i64: 16, 256>}]} {
    %c0_i32 = arith.constant 0 : i32
    %0 = arith.cmpi eq, %arg1, %c0_i32 : i32
    %1 = arith.extui %0 : i1 to i32
    %c0_i32_0 = arith.constant 0 : i32
    %2 = arith.cmpi ne, %1, %c0_i32_0 : i32
    scf.if %2 {
      %c0_6 = arith.constant 0 : index
      %c0_7 = arith.constant 0 : index
      %7 = vector.load %arg2[%c0_6, %c0_7] : memref<16x32xf32, #tpu.memory_space<vmem>>, vector<16x32xf32>
      %cst_8 = arith.constant dense<0.000000e+00> : vector<16xf32>
      %8 = vector.multi_reduction <add>, %7, %cst_8 [1] : vector<16x32xf32> to vector<16xf32>
      %9 = vector.shape_cast %8 : vector<16xf32> to vector<16x1xf32>
      %cst_9 = arith.constant 3.200000e+01 : f32
      %10 = vector.broadcast %cst_9 : f32 to vector<16x1xf32>
      %11 = arith.divf %9, %10 : vector<16x1xf32>
      %12 = vector.broadcast %11 : vector<16x1xf32> to vector<16x32xf32>
      %13 = arith.subf %7, %12 : vector<16x32xf32>
      %14 = arith.mulf %13, %13 : vector<16x32xf32>
      %cst_10 = arith.constant dense<0.000000e+00> : vector<16xf32>
      %15 = vector.multi_reduction <add>, %14, %cst_10 [1] : vector<16x32xf32> to vector<16xf32>
      %16 = vector.shape_cast %15 : vector<16xf32> to vector<16x1xf32>
      %cst_11 = arith.constant 3.200000e+01 : f32
      %17 = vector.broadcast %cst_11 : f32 to vector<16x1xf32>
      %18 = arith.divf %16, %17 : vector<16x1xf32>
      %cst_12 = arith.constant 9.99999974E-6 : f32
      %19 = vector.broadcast %cst_12 : f32 to vector<16x1xf32>
      %20 = arith.addf %18, %19 : vector<16x1xf32>
      %21 = math.rsqrt %20 : vector<16x1xf32>
      %22 = vector.broadcast %21 : vector<16x1xf32> to vector<16x32xf32>
      %23 = arith.mulf %13, %22 : vector<16x32xf32>
      %c0_13 = arith.constant 0 : index
      %c0_14 = arith.constant 0 : index
      %24 = vector.load %arg3[%c0_13, %c0_14] : memref<1x32xf32, #tpu.memory_space<vmem>>, vector<1x32xf32>
      %25 = vector.broadcast %24 : vector<1x32xf32> to vector<16x32xf32>
      %26 = arith.mulf %23, %25 : vector<16x32xf32>
      %c0_15 = arith.constant 0 : index
      %c0_16 = arith.constant 0 : index
      %27 = vector.load %arg4[%c0_15, %c0_16] : memref<1x32xf32, #tpu.memory_space<vmem>>, vector<1x32xf32>
      %28 = vector.broadcast %27 : vector<1x32xf32> to vector<16x32xf32>
      %29 = arith.addf %26, %28 : vector<16x32xf32>
      %30 = arith.truncf %29 : vector<16x32xf32> to vector<16x32xbf16>
      %c0_17 = arith.constant 0 : index
      %c0_18 = arith.constant 0 : index
      %31 = vector.load %arg7[%c0_17, %c0_18] : memref<16x32xbf16, #tpu.memory_space<vmem>>, vector<16x32xbf16>
      tpu.vector_store %arg7[%c0_17, %c0_18], %30 {strides = array<i32>} : memref<16x32xbf16, #tpu.memory_space<vmem>>, vector<16x32xbf16>,
    } else {
    }
    %c0 = arith.constant 0 : index
    %c0_1 = arith.constant 0 : index
    %3 = vector.load %arg7[%c0, %c0_1] : memref<16x32xbf16, #tpu.memory_space<vmem>>, vector<16x32xbf16>
    %c0_2 = arith.constant 0 : index
    %c0_3 = arith.constant 0 : index
    %4 = vector.load %arg5[%c0_2, %c0_3] : memref<256x32xbf16, #tpu.memory_space<vmem>>, vector<256x32xbf16>
    %cst = arith.constant dense<0.000000e+00> : vector<16x256xf32>
    %5 = tpu.matmul %3, %4, %cst {dimension_numbers = #tpu.dot_dimension_numbers<[1], [1], [0], [0], [0, 0, 1, 0], [], []>} : vector<16x32xbf16>, vector<256x32xbf16>, vector<16x256xf32> -> vector<16x256xf32>
    %c0_4 = arith.constant 0 : index
    %c0_5 = arith.constant 0 : index
    %6 = vector.load %arg6[%c0_4, %c0_5] : memref<16x256xf32, #tpu.memory_space<vmem>>, vector<16x256xf32>
    tpu.vector_store %arg6[%c0_4, %c0_5], %5 {strides = array<i32>} : memref<16x256xf32, #tpu.memory_space<vmem>>, vector<16x256xf32>,
    return
  }
  func.func @transform_0(%arg0: i32, %arg1: i32) -> (i32, i32) {
    %c0_i32 = arith.constant 0 : i32
    %c0_i32_0 = arith.constant 0 : i32
    return %arg0, %c0_i32 : i32, i32
  }
  func.func @transform_1(%arg0: i32, %arg1: i32) -> (i32, i32) {
    %c0_i32 = arith.constant 0 : i32
    %c0_i32_0 = arith.constant 0 : i32
    %c0_i32_1 = arith.constant 0 : i32
    return %c0_i32, %c0_i32_0 : i32, i32
  }
  func.func @transform_2(%arg0: i32, %arg1: i32) -> (i32, i32) {
    %c0_i32 = arith.constant 0 : i32
    %c0_i32_0 = arith.constant 0 : i32
    %c0_i32_1 = arith.constant 0 : i32
    return %c0_i32, %c0_i32_0 : i32, i32
  }
  func.func @transform_3(%arg0: i32, %arg1: i32) -> (i32, i32) {
    %c0_i32 = arith.constant 0 : i32
    %c0_i32_0 = arith.constant 0 : i32
    return %arg1, %c0_i32 : i32, i32
  }
  func.func @transform_4(%arg0: i32, %arg1: i32) -> (i32, i32) {
    %c0_i32 = arith.constant 0 : i32
    return %arg0, %arg1 : i32, i32
  }
}

</mosaic_0001>

<bundles_post_ra>
// kernel: tpu_custom_call.1
= control target key start
LH: loop header
LB: loop body
LE: loop exit
PB: predicated region body
PF: predicated region fallthrough
CT: control target
= control target key end

     0   :  { %vm24_vm0 = vcmask 261120   ;;  %s563_s0 = inlined_call_operand.vmem [shape: f32[16,32], index: 0, kind: input, shape index: {}]   ;;  %s564_s1 = inlined_call_operand.vmem [shape: f32[1,32], index: 1, kind: input, shape index: {}]   ;;  %s565_s2 = inlined_call_operand.vmem [shape: f32[1,32], index: 2, kind: input, shape index: {}]   ;;  %s566_s3 = inlined_call_operand.vmem [shape: bf16[256,32], index: 3, kind: input, shape index: {}]   ;;  %s567_s4 = inlined_call_operand.hbm [shape: f32[16,256], index: 4, kind: output, shape index: {}]  }
   0x1   :  { %v22_v0 = vld [vmem:[%s563_s0] sm:$0xff] }
   0x2   :  { %v25_v1 = vsel %vm24_vm0, %v22_v0, 0.0 }
   0x3   :  { %9 = vsyncpa [#allocation4], 0  ;;  %26 = vadd.xlane.f32.xlu0 %v25_v1  ;;  %v23_v2 = vld [vmem:[%s563_s0 + $0x8] sm:$0xff]  ;;  %v439_v4 = vmov 32.0   ;;  %v392_v7 = vld [vmem:[%s566_s3 + $0x38] sm:$0xff]  ;;  %vm90_vm6 = vcmask 257024  }
   0x4   :  { %v28_v3 = vsel %vm24_vm0, %v23_v2, 0.0  ;;  %407 = vrcp.f32 %v439_v4  ;;  %v400_v8 = vld [vmem:[%s566_s3 + $0x78] sm:$0xff]  ;;  %v238_v10 = vsel %vm24_vm0, %v392_v7, 0  ;;  %v391_v12 = vld [vmem:[%s566_s3 + $0x30] sm:$0xff]  ;;  %v390_v29 = vld [vmem:[%s566_s3 + $0x28] sm:$0xff]  ;;  %s302_s28 = sshll.u32 %s567_s4, 4  ;;  %s303_s28 = int_to_ptr.hbm [resolvable:$true] %s302_s28 }
   0x5   :  { %v262_v11 = vsel %vm24_vm0, %v400_v8, 0  ;;  %264 = vmatpush.bf16.xpose.msra.mxu0 %v238_v10  ;;  %v399_v13 = vld [vmem:[%s566_s3 + $0x70] sm:$0xff]  ;;  %v235_v15 = vsel %vm24_vm0, %v391_v12, 0  ;;  %v398_v30 = vld [vmem:[%s566_s3 + $0x68] sm:$0xff]  ;;  %v232_v31 = vsel %vm24_vm0, %v390_v29, 0  ;;  %v389_v33 = vld [vmem:[%s566_s3 + $0x20] sm:$0xff] }
   0x6   :  { %278 = vmatpush.bf16.xpose.msra.mxu1 %v262_v11  ;;  %v259_v16 = vsel %vm24_vm0, %v399_v13, 0  ;;  %v256_v32 = vsel %vm24_vm0, %v398_v30, 0  ;;  %v397_v34 = vld [vmem:[%s566_s3 + $0x60] sm:$0xff]  ;;  %v229_v35 = vsel %vm24_vm0, %v389_v33, 0  ;;  %v388_v37 = vld [vmem:[%s566_s3 + $0x18] sm:$0xff]  ;;  %v387_v41 = vld [vmem:[%s566_s3 + $0x10] sm:$0xff] }
   0x7   :  { %v253_v36 = vsel %vm24_vm0, %v397_v34, 0  ;;  %v396_v38 = vld [vmem:[%s566_s3 + $0x58] sm:$0xff]  ;;  %v226_v39 = vsel %vm24_vm0, %v388_v37, 0  ;;  %v395_v42 = vld [vmem:[%s566_s3 + $0x50] sm:$0xff]  ;;  %v223_v43 = vsel %vm24_vm0, %v387_v41, 0  ;;  %v386_v45 = vld [vmem:[%s566_s3 + $0x8] sm:$0xff] }
   0x8   :  { %v250_v40 = vsel %vm24_vm0, %v396_v38, 0  ;;  %v247_v44 = vsel %vm24_vm0, %v395_v42, 0  ;;  %v394_v46 = vld [vmem:[%s566_s3 + $0x48] sm:$0xff]  ;;  %v220_v48 = vsel %vm24_vm0, %v386_v45, 0  ;;  %v385_v52 = vld [vmem:[%s566_s3] sm:$0xff]  ;;  %s441_s29 = smov 256  }
   0x9   :  { %v244_v49 = vsel %vm24_vm0, %v394_v46, 0  ;;  %v393_v53 = vld [vmem:[%s566_s3 + $0x40] sm:$0xff]  ;;  %v217_v55 = vsel %vm24_vm0, %v385_v52, 0  ;;  %s442_s30 = smov 16  }
   0xa   :  { %v408_v5 = vpop.eup %407  ;;  %v241_v56 = vsel %vm24_vm0, %v393_v53, 0 }
   0xb   :  { %29 = vadd.xlane.f32.xlu0 %v28_v3  ;;  %v32_v6 = vmul.f32 32.0, %v408_v5  ;;  %vm36_vm1 = vweird.f32 %v408_v5  ;;  %v405_v3 = vld [vmem:[%s564_s1] ss:$0 sm:$0xff]  ;;  %s440_s1 = smov [#allocation3]  }
   0xd   :  { %v33_v9 = vsub.f32 1.0, %v32_v6  ;;  %265 = vmatpush.bf16.xpose.msra.mxu0 %v235_v15  ;;  %v406_v6 = vld [vmem:[%s565_s2] ss:$0 sm:$0xff]  ;;  %s300_s2 = sshll.u32 %s440_s1, 4  ;;  %s301_s2 = int_to_ptr.vmem [resolvable:$true] %s300_s2 }
   0xe   :  { %279 = vmatpush.bf16.xpose.msra.mxu1 %v259_v16 }
   0xf   :  { %v34_v14 = vmul.f32 %v408_v5, %v33_v9 }
  0x11   :  { %v35_v17 = vadd.f32 %v408_v5, %v34_v14 }
  0x13   :  { %v37_v18 = vsel %vm36_vm1, %v408_v5, %v35_v17 }
  0x15   :  { %266 = vmatpush.bf16.xpose.msra.mxu0 %v232_v31 }
  0x16   :  { %280 = vmatpush.bf16.xpose.msra.mxu1 %v256_v32 }
  0x1d   :  { %267 = vmatpush.bf16.xpose.msra.mxu0 %v229_v35 }
  0x1e   :  { %281 = vmatpush.bf16.xpose.msra.mxu1 %v253_v36 }
  0x25   :  { %268 = vmatpush.bf16.xpose.msra.mxu0 %v226_v39 }
  0x26   :  { %282 = vmatpush.bf16.xpose.msra.mxu1 %v250_v40 }
  0x2d   :  { %269 = vmatpush.bf16.xpose.msra.mxu0 %v223_v43 }
  0x2e   :  { %283 = vmatpush.bf16.xpose.msra.mxu1 %v247_v44 }
  0x35   :  { %270 = vmatpush.bf16.xpose.msra.mxu0 %v220_v48 }
  0x36   :  { %284 = vmatpush.bf16.xpose.msra.mxu1 %v244_v49 }
  0x3d   :  { %271 = vmatpush.bf16.xpose.msra.mxu0 %v217_v55 }
  0x3e   :  { %285 = vmatpush.bf16.xpose.msra.mxu1 %v241_v56 }
  0x76   :  { %v27_v19 = vpop.xlane.xlu0 %26 }
  0x77   :  { %v38_v20 = vmul.f32 %v37_v18, %v27_v19 }
  0x79   :  { %v492_v21 = vsub.f32 %v22_v0, %v38_v20 }
  0x7b   :  { %v42_v22 = vmul.f32 %v492_v21, %v492_v21 }
  0x7d   :  { %v44_v23 = vsel %vm24_vm0, %v42_v22, 0.0 }
  0x7e   :  { %45 = vadd.xlane.f32.xlu1 %v44_v23  ;;  %v30_v24 = vpop.xlane.xlu0 %29 }
  0x7f   :  { %v39_v25 = vmul.f32 %v37_v18, %v30_v24 }
  0x81   :  { %v497_v26 = vsub.f32 %v23_v2, %v39_v25 }
  0x83   :  { %v43_v27 = vmul.f32 %v497_v26, %v497_v26 }
  0x85   :  { %v47_v28 = vsel %vm24_vm0, %v43_v27, 0.0 }
  0x86   :  { %48 = vadd.xlane.f32.xlu1 %v47_v28 }
  0xf1   :  { %v46_v47 = vpop.xlane.xlu1 %45 }
  0xf2   :  { %v50_v50 = vmul.f32 %v46_v47, %v37_v18 }
  0xf4   :  { %v52_v51 = vadd.f32 1e-05, %v50_v50 }
  0xf6   :  { %409 = vrsqrt.f32 %v52_v51  ;;  %vm60_vm3 = vweird.f32 %v52_v51 }
  0xf9   :  { %v49_v54 = vpop.xlane.xlu1 %48 }
  0xfa   :  { %v51_v57 = vmul.f32 %v49_v54, %v37_v18 }
  0xfc   :  { %v410_v58 = vpop.eup %409  ;;  %v53_v59 = vadd.f32 1e-05, %v51_v57 }
  0xfd   :  { %v55_v60 = vmul.f32 %v410_v58, %v52_v51  ;;  %vm61_vm2 = vweird.f32 %v410_v58 }
  0xfe   :  { %411 = vrsqrt.f32 %v53_v59  ;;  %vm62_vm4 = vmor %vm60_vm3, %vm61_vm2  ;;  %vm70_vm7 = vweird.f32 %v53_v59 }
  0xff   :  { %v56_v61 = vmul.f32 %v410_v58, %v55_v60 }
 0x101   :  { %v57_v62 = vmul.f32 0.5, %v56_v61 }
 0x103   :  { %v58_v63 = vsub.f32 1.5, %v57_v62 }
 0x104   :  { %v412_v0 = vpop.eup %411 }
 0x105   :  { %v59_v1 = vmul.f32 %v410_v58, %v58_v63  ;;  %v65_v2 = vmul.f32 %v412_v0, %v53_v59  ;;  %vm71_vm5 = vweird.f32 %v412_v0 }
 0x106   :  { %vm72_vm8 = vmor %vm70_vm7, %vm71_vm5 }
 0x107   :  { %v63_v4 = vsel %vm62_vm4, %v410_v58, %v59_v1  ;;  %v66_v5 = vmul.f32 %v412_v0, %v65_v2 }
 0x108   :  { %v74_v7 = vmul.f32 %v63_v4, %v492_v21 }
 0x109   :  { %v67_v8 = vmul.f32 0.5, %v66_v5 }
 0x10a   :  { %v80_v9 = vmul.f32 %v405_v3, %v74_v7 }
 0x10b   :  { %v68_v10 = vsub.f32 1.5, %v67_v8 }
 0x10c   :  { %v86_v11 = vadd.f32 %v406_v6, %v80_v9 }
 0x10d   :  { %v69_v12 = vmul.f32 %v412_v0, %v68_v10 }
 0x10e   :  { %v88_v13 = vpack.c.bf16 %v86_v11, %v86_v11 }
 0x10f   :  { %v73_v14 = vsel %vm72_vm8, %v412_v0, %v69_v12 }
 0x110   :  { %91 = vst.msk [vmem:[#allocation2] sm:$0xf] %vm90_vm6, %v88_v13  ;;  %v75_v15 = vmul.f32 %v73_v14, %v497_v26 }
 0x112   :  { %v81_v16 = vmul.f32 %v405_v3, %v75_v15 }
 0x114   :  { %v87_v17 = vadd.f32 %v406_v6, %v81_v16 }
 0x116   :  { %v89_v18 = vpack.c.bf16 %v87_v17, %v87_v17 }
 0x118   :  { %92 = vst.msk [vmem:[#allocation2 + $0x4] sm:$0xf] %vm90_vm6, %v89_v18 }
 0x11f   :  { %v384_v19 = vld [vmem:[#allocation2] sm:$0xff] }
 0x120   :  { %382 = vmatmul.msk.bf16.vlgmr.msra.gmra.mxu0 %vm24_vm0, %v384_v19  ;;  %383 = vmatmul.msk.bf16.vlgmr.msra.gmra.mxu1 %vm24_vm0, %v384_v19 }
 0x19d   :  { %v273_v20 = vpop.f32.mrf.mxu0  ;;  %v287_v21 = vpop.f32.mrf.mxu1 }
 0x19e   :  { %292 = vst [vmem:[#allocation3] sm:$0xff] %v273_v20 }
 0x19f   :  { %293 = vst [vmem:[#allocation3 + $0x8] sm:$0xff] %v287_v21 }
 0x1a5   :  { %v275_v22 = vpop.f32.mrf.mxu0  ;;  %v289_v23 = vpop.f32.mrf.mxu1 }
 0x1a6   :  { %294 = vst [vmem:[#allocation3 + $0x10] sm:$0xff] %v275_v22 }
 0x1a7   :  { %295 = vst [vmem:[#allocation3 + $0x18] sm:$0xff] %v289_v23 }
 0x1a8   :  { %308 = dma.vmem_to_hbm [thread:$0]  %s301_s2, 512, %s303_s28, [#allocation4], %s441_s29, %s441_s29, %s442_s30  }
 0x1a9   :  { %437 = dma.done.wait [#allocation4], 512  }
 0x1aa   :  { %438 = vsyncadd [#allocation4], 4294966784 }
 0x1ab   :  { %313 = vsyncpa [#allocation4], 1 }

</bundles_post_ra>
